<compile_context>
chip_gen: v5e
topology: v5e:2x2
jax: 0.10.0
libtpu: 0.0.40
codegen_flags: <defaults>
</compile_context>

<pallas_src>
import math
from functools import partial

import jax
import jax.numpy as jnp
from jax import lax
from jax.experimental import pallas as pl
from jax.experimental.pallas import tpu as pltpu

_MIB = 1024 * 1024


def _vmem_limit(estimate_bytes):
    # floor at 32 MiB (plenty of headroom at small shapes), cap at 96 MiB.
    return int(min(max(estimate_bytes, 32 * _MIB), 96 * _MIB))


# ---------------------------------------------------------------------------
# Kernel 1: dense linear projection  y = x @ W_t + b   (full-width GEMM)
# ---------------------------------------------------------------------------
def _linear_kernel(x_ref, wt_ref, b_ref, y_ref):
    # bf16 MXU operands, f32 accumulation, f32 bias add, cast on store.
    x = x_ref[...].astype(jnp.bfloat16)
    w = wt_ref[...]                                   # already bf16
    y = jnp.dot(x, w, preferred_element_type=jnp.float32)
    y_ref[...] = (y + b_ref[...]).astype(y_ref.dtype)


def _linear(x2d, w_t_bf16, b_row_f32, out_dtype, *, tm_target=512):
    """x2d: (M, d_in) activations, w_t_bf16: (d_in, d_out) pre-transposed bf16
    weights, b_row_f32: (1, d_out) f32 bias."""
    M, d_in = x2d.shape
    d_out = w_t_bf16.shape[1]
    # Fixed tile with cdiv padding of the ragged last block (no tiny-tile or
    # full-extent fallbacks).
    tm = M if M <= tm_target else tm_target

    est = (2 * tm * d_in * x2d.dtype.itemsize           # x blocks (double buffered)
           + 2 * d_in * d_out * 2                        # bf16 weight (double buffered)
           + 2 * d_out * 4                               # bias
           + 2 * tm * d_out * jnp.dtype(out_dtype).itemsize  # out blocks
           + 2 * tm * d_out * 4)                         # f32 accum / cast temps

    return pl.pallas_call(
        _linear_kernel,
        grid=(pl.cdiv(M, tm),),
        in_specs=[
            pl.BlockSpec((tm, d_in), lambda i: (i, 0)),
            pl.BlockSpec((d_in, d_out), lambda i: (0, 0)),   # constant index: no re-DMA
            pl.BlockSpec((1, d_out), lambda i: (0, 0)),
        ],
        out_specs=pl.BlockSpec((tm, d_out), lambda i: (i, 0)),
        out_shape=jax.ShapeDtypeStruct((M, d_out), out_dtype),
        compiler_params=pltpu.CompilerParams(
            dimension_semantics=("parallel",),
            vmem_limit_bytes=_vmem_limit(est)),
    )(x2d, w_t_bf16, b_row_f32)


# ---------------------------------------------------------------------------
# Kernel 2: scaled-dot attention over a head group and a query tile
# ---------------------------------------------------------------------------
def _attn_kernel(q_ref, k_ref, v_ref, ctx_ref, attn_ref, *, group, d_head):
    # q_ref   : (1, t_lq, group*d_head)   bf16, pre-scaled projected queries
    # k_ref   : (1, Lk,   group*d_head)   bf16
    # v_ref   : (1, Lk,   group*d_head)   bf16
    # ctx_ref : (1, t_lq, group*d_head)   lane-dense slice of (B, Lq, dim)
    # attn_ref: (1, group, t_lq, Lk)
    #
    # One full-width (lane-dense) load per operand; per-head slices are taken
    # from the loaded values rather than re-slicing the refs per head.
    q_all = q_ref[0]          # (t_lq, gd)
    k_all = k_ref[0]          # (Lk,   gd)
    v_all = v_ref[0]          # (Lk,   gd)

    ctx_parts = []
    # TODO(synk): static Python loop does not bound per-head (t_lq, Lk)
    #             intermediate live ranges; acceptable for small `group`.
    for g in range(group):
        lo = g * d_head
        hi = lo + d_head
        qg = q_all[:, lo:hi]                              # (t_lq, d_head) bf16
        kg = k_all[:, lo:hi]                              # (Lk,   d_head) bf16
        vg = v_all[:, lo:hi]                              # (Lk,   d_head) bf16

        # scores: contraction on d_head of both operands (no explicit .T);
        # the 1/sqrt(d_model) scale is folded into the Q projection.
        s = lax.dot_general(qg, kg, (((1,), (1,)), ((), ())),
                            preferred_element_type=jnp.float32)   # (t_lq, Lk)

        # numerically stable softmax in f32; reciprocal on the EUP slot.
        m = jnp.max(s, axis=-1, keepdims=True)
        e = jnp.exp(s - m)
        denom = jnp.sum(e, axis=-1, keepdims=True)
        p = e * pl.reciprocal(denom, approx=True)                  # (t_lq, Lk) f32

        p_lo = p.astype(jnp.bfloat16)        # single cast, reused for PV + store
        attn_ref[0, g] = p_lo.astype(attn_ref.dtype)

        ctx_parts.append(jnp.dot(p_lo, vg, preferred_element_type=jnp.float32))

    # One unmasked full-width store of the whole head-group context slab.
    ctx_ref[0] = jnp.concatenate(ctx_parts, axis=-1).astype(ctx_ref.dtype)


def _pick_group(num_heads, d_head):
    """Smallest head group G dividing num_heads with G*d_head a multiple of 128
    lanes; falls back to all heads (block width == dim)."""
    for g in range(1, num_heads + 1):
        if num_heads % g == 0 and (g * d_head) % 128 == 0:
            return g
    return num_heads


def multi_head_attention(query, key, value, wq, bq, wk, bk, wv, bv, num_heads,
                         *, attn_dtype=jnp.bfloat16):
    """Pallas implementation of openspeech MultiHeadAttention.forward (mask=None).

    Returns (context: (B, Lq, dim) in query.dtype, attn: (B, H, Lq, Lk) in
    attn_dtype). attn defaults to bf16 to halve the dominant HBM writeback."""
    B, Lq, dim = query.shape
    Lk = key.shape[1]
    Lv = value.shape[1]
    assert dim % num_heads == 0
    assert Lk == Lv
    d_head = dim // num_heads
    out_dtype = query.dtype
    proj_dtype = jnp.bfloat16            # intermediate Q/K/V dtype

    # openspeech DotProductAttention(dim, scale=True) divides by sqrt(d_model)
    # (NOT sqrt(d_head)). Intentional; do not "fix".
    scale = 1.0 / math.sqrt(dim)

    # Pre-transpose nn.Linear weights (W:(out,in) -> (in,out)) at trace time,
    # fold the attention scale into the Q projection (exactly equivalent), and
    # cast weights to bf16 (MXU-native). Biases stay f32 (added to f32 accum).
    wq_t = (wq.T * scale).astype(jnp.bfloat16)
    wk_t = wk.T.astype(jnp.bfloat16)
    wv_t = wv.T.astype(jnp.bfloat16)
    bq_s = (bq * scale).reshape(1, dim).astype(jnp.float32)
    bk_r = bk.reshape(1, dim).astype(jnp.float32)
    bv_r = bv.reshape(1, dim).astype(jnp.float32)

    if (query is key) and (key is value):
        # Self-attention: fuse the three projections into one GEMM so the
        # activation is read from HBM once and we pay one pipeline ramp.
        w_qkv = jnp.concatenate([wq_t, wk_t, wv_t], axis=1)      # (dim, 3*dim)
        b_qkv = jnp.concatenate([bq_s, bk_r, bv_r], axis=1)      # (1, 3*dim)
        qkv = _linear(query.reshape(B * Lq, dim), w_qkv, b_qkv, proj_dtype)
        q_proj = qkv[:, :dim].reshape(B, Lq, dim)
        k_proj = qkv[:, dim:2 * dim].reshape(B, Lk, dim)
        v_proj = qkv[:, 2 * dim:].reshape(B, Lv, dim)
    else:
        q_proj = _linear(query.reshape(B * Lq, dim), wq_t, bq_s, proj_dtype).reshape(B, Lq, dim)
        k_proj = _linear(key.reshape(B * Lk, dim), wk_t, bk_r, proj_dtype).reshape(B, Lk, dim)
        v_proj = _linear(value.reshape(B * Lv, dim), wv_t, bv_r, proj_dtype).reshape(B, Lv, dim)

    # Head grouping + Lq tiling for the attention kernel.
    group = _pick_group(num_heads, d_head)
    gd = group * d_head
    n_hg = num_heads // group
    t_lq = Lq if Lq <= 256 else 256          # fixed q tile; cdiv pads ragged tail
    n_q = pl.cdiv(Lq, t_lq)

    attn_isz = jnp.dtype(attn_dtype).itemsize
    ctx_isz = jnp.dtype(out_dtype).itemsize
    est = (2 * t_lq * gd * 2                        # Q blocks (bf16, double buffered)
           + 2 * 2 * Lk * gd * 2                    # K and V blocks (bf16)
           + 2 * t_lq * gd * ctx_isz                # ctx output blocks
           + 2 * group * t_lq * Lk * attn_isz       # attn output blocks
           + 4 * t_lq * Lk * 4)                     # softmax intermediates (f32)

    q_spec = pl.BlockSpec((1, t_lq, gd), lambda b, hg, qi: (b, qi, hg))
    k_spec = pl.BlockSpec((1, Lk, gd), lambda b, hg, qi: (b, 0, hg))
    v_spec = pl.BlockSpec((1, Lk, gd), lambda b, hg, qi: (b, 0, hg))
    ctx_spec = pl.BlockSpec((1, t_lq, gd), lambda b, hg, qi: (b, qi, hg))
    attn_spec = pl.BlockSpec((1, group, t_lq, Lk), lambda b, hg, qi: (b, hg, qi, 0))

    context, attn = pl.pallas_call(
        partial(_attn_kernel, group=group, d_head=d_head),
        grid=(B, n_hg, n_q),
        in_specs=[q_spec, k_spec, v_spec],
        out_specs=[ctx_spec, attn_spec],
        out_shape=[
            jax.ShapeDtypeStruct((B, Lq, dim), out_dtype),          # lane-dense, final layout
            jax.ShapeDtypeStruct((B, num_heads, Lq, Lk), attn_dtype),
        ],
        compiler_params=pltpu.CompilerParams(
            # All axes are independent (no reduction axis); K/V stay resident
            # across q tiles because their block index is constant over qi.
            # Marking qi "parallel" lets v7x's second TensorCore help when
            # B * n_hg is small.
            dimension_semantics=("parallel", "parallel", "parallel"),
            vmem_limit_bytes=_vmem_limit(est)),
    )(q_proj, k_proj, v_proj)

    return context, attn


# ---------------------------------------------------------------------------
# Pure-JAX reference (full f32, exact module semantics)
# ---------------------------------------------------------------------------
def _reference(query, key, value, wq, bq, wk, bk, wv, bv, num_heads):
    B, Lq, dim = query.shape
    d_head = dim // num_heads

    def proj(x, w, b):
        y = x @ w.T + b
        return y.reshape(B, -1, num_heads, d_head).transpose(0, 2, 1, 3)

    Q, K, V = proj(query, wq, bq), proj(key, wk, bk), proj(value, wv, bv)
    s = jnp.einsum("bhqd,bhkd->bhqk", Q, K) / math.sqrt(dim)
    attn = jax.nn.softmax(s, axis=-1)
    ctx = jnp.einsum("bhqk,bhkd->bhqd", attn, V)
    ctx = ctx.transpose(0, 2, 1, 3).reshape(B, Lq, dim)
    return ctx, attn


if __name__ == "__main__":
    B, L, dim, num_heads = 2, 8, 32, 4

    root = jax.random.PRNGKey(0)
    ks = jax.random.split(root, 9)

    query = jax.random.normal(ks[0], (B, L, dim), jnp.float32)
    key_t = jax.random.normal(ks[1], (B, L, dim), jnp.float32)
    value = jax.random.normal(ks[2], (B, L, dim), jnp.float32)

    # deterministic synthetic params (xavier-uniform-like weights, small biases)
    bound = math.sqrt(6.0 / (dim + dim))
    wq = jax.random.uniform(ks[3], (dim, dim), jnp.float32, -bound, bound)
    wk = jax.random.uniform(ks[4], (dim, dim), jnp.float32, -bound, bound)
    wv = jax.random.uniform(ks[5], (dim, dim), jnp.float32, -bound, bound)
    bq = jax.random.uniform(ks[6], (dim,), jnp.float32, -0.1, 0.1)
    bk = jax.random.uniform(ks[7], (dim,), jnp.float32, -0.1, 0.1)
    bv = jax.random.uniform(ks[8], (dim,), jnp.float32, -0.1, 0.1)

    # --- cross-attention path (separate Q/K/V projections) ---
    context, attn = multi_head_attention(
        query, key_t, value, wq, bq, wk, bk, wv, bv, num_heads)
    jax.block_until_ready((context, attn))

    ctx_ref, attn_ref = _reference(
        query, key_t, value, wq, bq, wk, bk, wv, bv, num_heads)

    assert context.shape == (B, L, dim)
    assert attn.shape == (B, num_heads, L, L)
    # bf16 projections + bf16 MXU operands + approx reciprocal + bf16 attn
    # output => relaxed tolerances vs. the f32 reference.
    assert jnp.allclose(context.astype(jnp.float32), ctx_ref, atol=1e-1, rtol=1e-1)
    assert jnp.allclose(attn.astype(jnp.float32), attn_ref, atol=5e-2, rtol=5e-2)

    # --- self-attention path (fused QKV projection) ---
    context_s, attn_s = multi_head_attention(
        query, query, query, wq, bq, wk, bk, wv, bv, num_heads)
    jax.block_until_ready((context_s, attn_s))

    ctx_ref_s, attn_ref_s = _reference(
        query, query, query, wq, bq, wk, bk, wv, bv, num_heads)

    assert context_s.shape == (B, L, dim)
    assert attn_s.shape == (B, num_heads, L, L)
    assert jnp.allclose(context_s.astype(jnp.float32), ctx_ref_s, atol=1e-1, rtol=1e-1)
    assert jnp.allclose(attn_s.astype(jnp.float32), attn_ref_s, atol=5e-2, rtol=5e-2)

    print("KERNEL_OK")
</pallas_src>

<mosaic_0001>
module attributes {stable_mosaic.version = 11 : i64} {
  func.func @_linear_kernel(%arg0: i32, %arg1: memref<16x32xf32, #tpu.memory_space<vmem>>, %arg2: memref<32x32xbf16, #tpu.memory_space<vmem>>, %arg3: memref<1x32xf32, #tpu.memory_space<vmem>>, %arg4: memref<16x32xbf16, #tpu.memory_space<vmem>>) attributes {dimension_semantics = [#tpu.dimension_semantics<parallel>], iteration_bounds = array<i64: 1>, scalar_prefetch = 0 : i64, scratch_operands = 0 : i64, tpu.core_type = #tpu.core_type<tc>, window_params = [{transform_indices = @transform_0, window_bounds = array<i64: 16, 32>}, {pipeline_mode = #tpu.pipeline_mode<synchronous>, transform_indices = @transform_1, window_bounds = array<i64: 32, 32>}, {pipeline_mode = #tpu.pipeline_mode<synchronous>, transform_indices = @transform_2, window_bounds = array<i64: 1, 32>}, {transform_indices = @transform_3, window_bounds = array<i64: 16, 32>}]} {
    %c0 = arith.constant 0 : index
    %c0_0 = arith.constant 0 : index
    %0 = vector.load %arg1[%c0, %c0_0] : memref<16x32xf32, #tpu.memory_space<vmem>>, vector<16x32xf32>
    %1 = arith.truncf %0 : vector<16x32xf32> to vector<16x32xbf16>
    %c0_1 = arith.constant 0 : index
    %c0_2 = arith.constant 0 : index
    %2 = vector.load %arg2[%c0_1, %c0_2] : memref<32x32xbf16, #tpu.memory_space<vmem>>, vector<32x32xbf16>
    %cst = arith.constant dense<0.000000e+00> : vector<16x32xf32>
    %3 = tpu.matmul %1, %2, %cst {dimension_numbers = #tpu.dot_dimension_numbers<[1], [0], [0], [1], [0, 0, 1, 1], [], []>} : vector<16x32xbf16>, vector<32x32xbf16>, vector<16x32xf32> -> vector<16x32xf32>
    %c0_3 = arith.constant 0 : index
    %c0_4 = arith.constant 0 : index
    %4 = vector.load %arg3[%c0_3, %c0_4] : memref<1x32xf32, #tpu.memory_space<vmem>>, vector<1x32xf32>
    %5 = vector.broadcast %4 : vector<1x32xf32> to vector<16x32xf32>
    %6 = arith.addf %3, %5 : vector<16x32xf32>
    %7 = arith.truncf %6 : vector<16x32xf32> to vector<16x32xbf16>
    %c0_5 = arith.constant 0 : index
    %c0_6 = arith.constant 0 : index
    %8 = vector.load %arg4[%c0_5, %c0_6] : memref<16x32xbf16, #tpu.memory_space<vmem>>, vector<16x32xbf16>
    tpu.vector_store %arg4[%c0_5, %c0_6], %7 {strides = array<i32>} : memref<16x32xbf16, #tpu.memory_space<vmem>>, vector<16x32xbf16>,
    return
  }
  func.func @transform_0(%arg0: i32) -> (i32, i32) {
    %c0_i32 = arith.constant 0 : i32
    %c0_i32_0 = arith.constant 0 : i32
    return %arg0, %c0_i32 : i32, i32
  }
  func.func @transform_1(%arg0: i32) -> (i32, i32) {
    %c0_i32 = arith.constant 0 : i32
    %c0_i32_0 = arith.constant 0 : i32
    %c0_i32_1 = arith.constant 0 : i32
    return %c0_i32, %c0_i32_0 : i32, i32
  }
  func.func @transform_2(%arg0: i32) -> (i32, i32) {
    %c0_i32 = arith.constant 0 : i32
    %c0_i32_0 = arith.constant 0 : i32
    %c0_i32_1 = arith.constant 0 : i32
    return %c0_i32, %c0_i32_0 : i32, i32
  }
  func.func @transform_3(%arg0: i32) -> (i32, i32) {
    %c0_i32 = arith.constant 0 : i32
    %c0_i32_0 = arith.constant 0 : i32
    return %arg0, %c0_i32 : i32, i32
  }
}

</mosaic_0001>

<bundles_post_ra>
// kernel: tpu_custom_call.1
= control target key start
LH: loop header
LB: loop body
LE: loop exit
PB: predicated region body
PF: predicated region fallthrough
CT: control target
= control target key end

     0   :  { %8 = vsyncpa [#allocation3], 0  ;;  %s256_s0 = inlined_call_operand.hbm [shape: f32[16,32], index: 0, kind: input, shape index: {}]   ;;  %s257_s1 = inlined_call_operand.hbm [shape: bf16[32,32], index: 1, kind: input, shape index: {}]   ;;  %s258_s2 = inlined_call_operand.vmem [shape: f32[1,32], index: 2, kind: input, shape index: {}]   ;;  %s259_s3 = inlined_call_operand.hbm [shape: bf16[16,32], index: 3, kind: output, shape index: {}]  }
   0x1   :  { %9 = vsyncpa [#allocation6], 0 }
   0x2   :  { %10 = vsyncpa [#allocation4], 0  ;;  %s15_s14 = sshll.u32 %s256_s0, 4  ;;  %s211_s15 = smov [#allocation2]   ;;  %s16_s14 = int_to_ptr.hbm [resolvable:$true] %s15_s14 }
   0x3   :  { %s17_s16 = sshll.u32 %s211_s15, 4  ;;  %s28_s19 = sshll.u32 %s257_s1, 4  ;;  %s18_s16 = int_to_ptr.vmem [resolvable:$true] %s17_s16  ;;  %s29_s19 = int_to_ptr.hbm [resolvable:$true] %s28_s19 }
   0x4   :  { %s212_s20 = smov 128   ;;  %s213_s21 = smov 8  }
   0x5   :  { %23 = dma.hbm_to_vmem [thread:$0]  %s16_s14, 256, %s18_s16, [#allocation3], %s212_s20, %s212_s20, %s213_s21  }
   0x6   :  { %s214_s22 = smov [#allocation5]   ;;  %s215_s24 = smov 64  }
   0x7   :  { %s30_s23 = sshll.u32 %s214_s22, 4  ;;  %s216_s25 = smov 4   ;;  %s31_s23 = int_to_ptr.vmem [resolvable:$true] %s30_s23 }
   0x8   :  { %36 = dma.hbm_to_vmem [thread:$0]  %s29_s19, 256, %s31_s23, [#allocation6], %s215_s24, %s215_s24, %s216_s25  }
   0x9   :  { %205 = dma.done.wait [#allocation3], 256  }
   0xa   :  { %206 = vsyncadd [#allocation3], 4294967040 }
   0xb   :  { %207 = dma.done.wait [#allocation6], 256  }
   0xc   :  { %208 = vsyncadd [#allocation6], 4294967040  ;;  %v124_v0 = vld [vmem:[#allocation5 + $0x8] sm:$0xff]  ;;  %v123_v1 = vld [vmem:[#allocation5] sm:$0xff]  ;;  %vm71_vm0 = vcmask 261120   ;;  %vm91_vm1 = vcmask 257024  }
   0xd   :  { %81 = vmatpush.bf16.msra.mxu0 %v124_v0  ;;  %v48_v2 = vld [vmem:[#allocation2] sm:$0xff]  ;;  %v49_v3 = vld [vmem:[#allocation2 + $0x8] sm:$0xff]  ;;  %s217_s26 = smov [#allocation7]   ;;  %s100_s30 = sshll.u32 %s259_s3, 4  ;;  %s101_s30 = int_to_ptr.hbm [resolvable:$true] %s100_s30 }
   0xe   :  { %v50_v4 = vpack.c.bf16 %v49_v3, %v48_v2  ;;  %v132_v5 = vld [vmem:[%s258_s2] ss:$0 sm:$0xff]  ;;  %s98_s27 = sshll.u32 %s217_s26, 4  ;;  %s99_s27 = int_to_ptr.vmem [resolvable:$true] %s98_s27 }
  0x11   :  { %82 = vmatpush.bf16.msra.mxu0 %v123_v1 }
  0x14   :  { %122 = vmatmul.msk.bf16.vlgmr.msra.gmra.mxu0 %vm71_vm0, %v50_v4 }
  0x91   :  { %v84_v6 = vpop.f32.mrf.mxu0 }
  0x92   :  { %v85_v7 = vadd.f32 %v132_v5, %v84_v6 }
  0x94   :  { %v89_v8 = vpack.c.bf16 %v85_v7, %v85_v7 }
  0x96   :  { %92 = vst.msk [vmem:[#allocation7] sm:$0xf] %vm91_vm1, %v89_v8 }
  0x99   :  { %v86_v9 = vpop.f32.mrf.mxu0 }
  0x9a   :  { %v87_v10 = vadd.f32 %v132_v5, %v86_v9 }
  0x9c   :  { %v90_v11 = vpack.c.bf16 %v87_v10, %v87_v10 }
  0x9e   :  { %93 = vst.msk [vmem:[#allocation7 + $0x4] sm:$0xf] %vm91_vm1, %v90_v11 }
  0x9f   :  { %106 = dma.vmem_to_hbm [thread:$0]  %s99_s27, 128, %s101_s30, [#allocation4], %s215_s24, %s215_s24, %s216_s25  }
  0xa0   :  { %209 = dma.done.wait [#allocation4], 128  }
  0xa1   :  { %210 = vsyncadd [#allocation4], 4294967168 }
  0xa2   :  { %111 = vsyncpa [#allocation3], 1 }
  0xa3   :  { %112 = vsyncpa [#allocation6], 1 }
  0xa4   :  { %113 = vsyncpa [#allocation4], 1 }

</bundles_post_ra>
